<compile_context>
chip_gen: v7x
topology: tpu7x:2x2x1
jax: 0.10.0
libtpu: 0.0.40
codegen_flags: <defaults>
</compile_context>

<pallas_src>
import functools

import jax
import jax.numpy as jnp
from jax.experimental import pallas as pl
from jax.experimental.pallas import tpu as pltpu


LN_EPS = 1e-5      # PyTorch nn.LayerNorm default eps
LANE = 128
SUBLANE = 8


def _round_up(x, m):
    return (x + m - 1) // m * m


def _mlp_kernel(n_layers, n_hidden, x_ref, *args):
    """One batch tile of the whole MLP.

    args = [W1, b1, g1, be1, ..., Wn, bn, gn, ben, W_out, b_out, out_ref]
    Weights are zero-padded to a lane-dense hidden dim; gamma/beta are zero in
    the padded lanes so padded activations remain exactly 0 through every layer.
    """
    out_ref = args[-1]
    p = args[:-1]
    inv_n = 1.0 / float(n_hidden)  # LayerNorm divides by the TRUE feature count

    h = x_ref[...].astype(jnp.float32)
    idx = 0
    for _ in range(n_layers):
        w = p[idx][...]           # (d_in_or_Hpad, Hpad)
        b = p[idx + 1][...]       # (1, Hpad)
        gamma = p[idx + 2][...]   # (1, Hpad), 0 in padded lanes
        beta = p[idx + 3][...]    # (1, Hpad), 0 in padded lanes
        idx += 4

        # Linear (padded columns are zero -> padded lanes of h are exactly 0)
        h = jnp.dot(h, w, preferred_element_type=jnp.float32) + b

        # Fused single-pass LayerNorm over the true n_hidden features.
        s1 = jnp.sum(h, axis=-1, keepdims=True)
        s2 = jnp.sum(h * h, axis=-1, keepdims=True)
        mu = s1 * inv_n
        var = jnp.maximum(s2 * inv_n - mu * mu, 0.0)
        scale = gamma * jax.lax.rsqrt(var + LN_EPS)   # gamma folded into scale
        shift = beta - mu * scale
        # Affine + ReLU (padded lanes: scale=shift=0 -> stay 0)
        h = jnp.maximum(h * scale + shift, 0.0)

    w_out = p[idx][...]       # (Hpad, n_outputs), padded rows are zero
    b_out = p[idx + 1][...]   # (1, n_outputs)
    y = jnp.dot(h, w_out, preferred_element_type=jnp.float32) + b_out
    out_ref[...] = y.astype(out_ref.dtype)


def _pad_params(params, n_layers, n_hidden):
    """Zero-pad hidden dims of the logical params to a multiple of 128 lanes."""
    h_pad = _round_up(n_hidden, LANE)
    pad_h = h_pad - n_hidden
    out = []
    idx = 0
    for li in range(n_layers):
        w, b, gamma, beta = params[idx:idx + 4]
        idx += 4
        row_pad = 0 if li == 0 else pad_h   # first layer keeps the true d_in rows
        out.append(jnp.pad(w, ((0, row_pad), (0, pad_h))))
        out.append(jnp.pad(b, ((0, 0), (0, pad_h))))
        out.append(jnp.pad(gamma, ((0, 0), (0, pad_h))))   # padded gamma = 0
        out.append(jnp.pad(beta, ((0, 0), (0, pad_h))))    # padded beta = 0
    w_out, b_out = params[idx], params[idx + 1]
    out.append(jnp.pad(w_out, ((0, pad_h), (0, 0))))
    out.append(b_out)
    return out


def predictor_forward(x, params, n_layers, n_hidden, n_outputs, max_tile_b=512):
    """params is a flat list of LOGICAL (unpadded) arrays: [W1,b1,g1,be1,...,W_out,b_out]."""
    batch, d_in = x.shape
    padded_params = _pad_params(params, n_layers, n_hidden)

    # Batch tile: multiple of 8 sublanes, up to max_tile_b (sized well under the
    # v7x 64 MiB VMEM budget: resident params + 2x double-buffered x/out tiles).
    tile_b = min(max_tile_b, _round_up(batch, SUBLANE))
    batch_pad = _round_up(batch, tile_b)
    if batch_pad != batch:
        x = jnp.pad(x, ((0, batch_pad - batch), (0, 0)))
    grid = (batch_pad // tile_b,)

    x_spec = pl.BlockSpec((tile_b, d_in), lambda i: (i, 0))
    # Full-shape blocks with constant index maps: loaded to VMEM once, resident
    # across all batch grid steps (no per-step re-DMA).
    param_specs = [pl.BlockSpec(p.shape, lambda i: (0, 0)) for p in padded_params]
    out_spec = pl.BlockSpec((tile_b, n_outputs), lambda i: (i, 0))

    kernel = functools.partial(_mlp_kernel, n_layers, n_hidden)
    out = pl.pallas_call(
        kernel,
        out_shape=jax.ShapeDtypeStruct((batch_pad, n_outputs), jnp.float32),
        grid=grid,
        in_specs=[x_spec] + param_specs,
        out_specs=out_spec,
        compiler_params=pltpu.CompilerParams(
            dimension_semantics=("parallel",)),  # shards batch across TCs on v7x
    )(x, *padded_params)
    return out[:batch]


def init_params(key, n_inputs, n_states, n_hidden, n_layers, n_outputs):
    """Deterministic PyTorch-style init (uniform +/- 1/sqrt(fan_in)), logical shapes."""
    params = []
    d_in = n_states + n_inputs
    dims = [d_in] + [n_hidden] * n_layers
    for li in range(n_layers):
        fan_in, fan_out = dims[li], dims[li + 1]
        key, kw, kb = jax.random.split(key, 3)
        bound = 1.0 / jnp.sqrt(fan_in)
        w = jax.random.uniform(kw, (fan_in, fan_out), jnp.float32, -bound, bound)
        b = jax.random.uniform(kb, (1, fan_out), jnp.float32, -bound, bound)
        gamma = jnp.ones((1, fan_out), jnp.float32)
        beta = jnp.zeros((1, fan_out), jnp.float32)
        params += [w, b, gamma, beta]
    key, kw, kb = jax.random.split(key, 3)
    bound = 1.0 / jnp.sqrt(n_hidden)
    w_out = jax.random.uniform(kw, (n_hidden, n_outputs), jnp.float32, -bound, bound)
    b_out = jax.random.uniform(kb, (1, n_outputs), jnp.float32, -bound, bound)
    params += [w_out, b_out]
    return params


def reference_forward(x, params, n_layers):
    """Pure-JAX reference (two-pass LayerNorm) for correctness checking."""
    h = x
    idx = 0
    for _ in range(n_layers):
        w, b, gamma, beta = params[idx:idx + 4]
        idx += 4
        h = h @ w + b
        mu = jnp.mean(h, axis=-1, keepdims=True)
        var = jnp.mean((h - mu) ** 2, axis=-1, keepdims=True)
        h = (h - mu) / jnp.sqrt(var + LN_EPS) * gamma + beta
        h = jnp.maximum(h, 0.0)
    w_out, b_out = params[idx], params[idx + 1]
    return h @ w_out + b_out


if __name__ == "__main__":
    # Small shapes consistent with the module's forward.
    n_inputs, n_states, n_hidden, n_layers, n_outputs = 4, 4, 32, 3, 1
    batch = 8

    key = jax.random.PRNGKey(0)
    key, kx = jax.random.split(key)
    x = jax.random.normal(kx, (batch, n_states + n_inputs), jnp.float32)
    params = init_params(key, n_inputs, n_states, n_hidden, n_layers, n_outputs)

    out = predictor_forward(x, params, n_layers, n_hidden, n_outputs)
    out = jax.block_until_ready(out)

    ref = reference_forward(x, params, n_layers)
    assert out.shape == (batch, n_outputs), out.shape
    assert jnp.allclose(out, ref, atol=2e-4, rtol=2e-4), (out, ref)

    print("KERNEL_OK")
</pallas_src>

<mosaic_0001>
module attributes {stable_mosaic.version = 11 : i64} {
  func.func @_mlp_kernel(%arg0: i32, %arg1: memref<8x8xf32, #tpu.memory_space<vmem>>, %arg2: memref<8x128xf32, #tpu.memory_space<vmem>>, %arg3: memref<1x128xf32, #tpu.memory_space<vmem>>, %arg4: memref<1x128xf32, #tpu.memory_space<vmem>>, %arg5: memref<1x128xf32, #tpu.memory_space<vmem>>, %arg6: memref<128x128xf32, #tpu.memory_space<vmem>>, %arg7: memref<1x128xf32, #tpu.memory_space<vmem>>, %arg8: memref<1x128xf32, #tpu.memory_space<vmem>>, %arg9: memref<1x128xf32, #tpu.memory_space<vmem>>, %arg10: memref<128x128xf32, #tpu.memory_space<vmem>>, %arg11: memref<1x128xf32, #tpu.memory_space<vmem>>, %arg12: memref<1x128xf32, #tpu.memory_space<vmem>>, %arg13: memref<1x128xf32, #tpu.memory_space<vmem>>, %arg14: memref<128x1xf32, #tpu.memory_space<vmem>>, %arg15: memref<1x1xf32, #tpu.memory_space<vmem>>, %arg16: memref<8x1xf32, #tpu.memory_space<vmem>>) attributes {dimension_semantics = [#tpu.dimension_semantics<parallel>], iteration_bounds = array<i64: 1>, scalar_prefetch = 0 : i64, scratch_operands = 0 : i64, tpu.core_type = #tpu.core_type<tc>, window_params = [{transform_indices = @transform_0, window_bounds = array<i64: 8, 8>}, {pipeline_mode = #tpu.pipeline_mode<synchronous>, transform_indices = @transform_1, window_bounds = array<i64: 8, 128>}, {pipeline_mode = #tpu.pipeline_mode<synchronous>, transform_indices = @transform_2, window_bounds = array<i64: 1, 128>}, {pipeline_mode = #tpu.pipeline_mode<synchronous>, transform_indices = @transform_3, window_bounds = array<i64: 1, 128>}, {pipeline_mode = #tpu.pipeline_mode<synchronous>, transform_indices = @transform_4, window_bounds = array<i64: 1, 128>}, {pipeline_mode = #tpu.pipeline_mode<synchronous>, transform_indices = @transform_5, window_bounds = array<i64: 128, 128>}, {pipeline_mode = #tpu.pipeline_mode<synchronous>, transform_indices = @transform_6, window_bounds = array<i64: 1, 128>}, {pipeline_mode = #tpu.pipeline_mode<synchronous>, transform_indices = @transform_7, window_bounds = array<i64: 1, 128>}, {pipeline_mode = #tpu.pipeline_mode<synchronous>, transform_indices = @transform_8, window_bounds = array<i64: 1, 128>}, {pipeline_mode = #tpu.pipeline_mode<synchronous>, transform_indices = @transform_9, window_bounds = array<i64: 128, 128>}, {pipeline_mode = #tpu.pipeline_mode<synchronous>, transform_indices = @transform_10, window_bounds = array<i64: 1, 128>}, {pipeline_mode = #tpu.pipeline_mode<synchronous>, transform_indices = @transform_11, window_bounds = array<i64: 1, 128>}, {pipeline_mode = #tpu.pipeline_mode<synchronous>, transform_indices = @transform_12, window_bounds = array<i64: 1, 128>}, {pipeline_mode = #tpu.pipeline_mode<synchronous>, transform_indices = @transform_13, window_bounds = array<i64: 128, 1>}, {pipeline_mode = #tpu.pipeline_mode<synchronous>, transform_indices = @transform_14, window_bounds = array<i64: 1, 1>}, {transform_indices = @transform_15, window_bounds = array<i64: 8, 1>}]} {
    %c0 = arith.constant 0 : index
    %c0_0 = arith.constant 0 : index
    %0 = vector.load %arg1[%c0, %c0_0] : memref<8x8xf32, #tpu.memory_space<vmem>>, vector<8x8xf32>
    %c0_1 = arith.constant 0 : index
    %c0_2 = arith.constant 0 : index
    %1 = vector.load %arg2[%c0_1, %c0_2] : memref<8x128xf32, #tpu.memory_space<vmem>>, vector<8x128xf32>
    %c0_3 = arith.constant 0 : index
    %c0_4 = arith.constant 0 : index
    %2 = vector.load %arg3[%c0_3, %c0_4] : memref<1x128xf32, #tpu.memory_space<vmem>>, vector<1x128xf32>
    %c0_5 = arith.constant 0 : index
    %c0_6 = arith.constant 0 : index
    %3 = vector.load %arg4[%c0_5, %c0_6] : memref<1x128xf32, #tpu.memory_space<vmem>>, vector<1x128xf32>
    %c0_7 = arith.constant 0 : index
    %c0_8 = arith.constant 0 : index
    %4 = vector.load %arg5[%c0_7, %c0_8] : memref<1x128xf32, #tpu.memory_space<vmem>>, vector<1x128xf32>
    %cst = arith.constant dense<0.000000e+00> : vector<8x128xf32>
    %5 = tpu.matmul %0, %1, %cst {dimension_numbers = #tpu.dot_dimension_numbers<[1], [0], [0], [1], [0, 0, 1, 1], [], []>} : vector<8x8xf32>, vector<8x128xf32>, vector<8x128xf32> -> vector<8x128xf32>
    %6 = vector.broadcast %2 : vector<1x128xf32> to vector<8x128xf32>
    %7 = arith.addf %5, %6 : vector<8x128xf32>
    %cst_9 = arith.constant dense<0.000000e+00> : vector<8xf32>
    %8 = vector.multi_reduction <add>, %7, %cst_9 [1] : vector<8x128xf32> to vector<8xf32>
    %9 = vector.shape_cast %8 : vector<8xf32> to vector<8x1xf32>
    %10 = arith.mulf %7, %7 : vector<8x128xf32>
    %cst_10 = arith.constant dense<0.000000e+00> : vector<8xf32>
    %11 = vector.multi_reduction <add>, %10, %cst_10 [1] : vector<8x128xf32> to vector<8xf32>
    %12 = vector.shape_cast %11 : vector<8xf32> to vector<8x1xf32>
    %cst_11 = arith.constant 3.125000e-02 : f32
    %13 = vector.broadcast %cst_11 : f32 to vector<8x1xf32>
    %14 = arith.mulf %9, %13 : vector<8x1xf32>
    %cst_12 = arith.constant 3.125000e-02 : f32
    %15 = vector.broadcast %cst_12 : f32 to vector<8x1xf32>
    %16 = arith.mulf %12, %15 : vector<8x1xf32>
    %17 = arith.mulf %14, %14 : vector<8x1xf32>
    %18 = arith.subf %16, %17 : vector<8x1xf32>
    %cst_13 = arith.constant 0.000000e+00 : f32
    %19 = vector.broadcast %cst_13 : f32 to vector<8x1xf32>
    %20 = arith.maximumf %18, %19 : vector<8x1xf32>
    %cst_14 = arith.constant 9.99999974E-6 : f32
    %21 = vector.broadcast %cst_14 : f32 to vector<8x1xf32>
    %22 = arith.addf %20, %21 : vector<8x1xf32>
    %23 = math.rsqrt %22 : vector<8x1xf32>
    %24 = vector.broadcast %3 : vector<1x128xf32> to vector<8x128xf32>
    %25 = vector.broadcast %23 : vector<8x1xf32> to vector<8x128xf32>
    %26 = arith.mulf %24, %25 : vector<8x128xf32>
    %27 = vector.broadcast %14 : vector<8x1xf32> to vector<8x128xf32>
    %28 = arith.mulf %27, %26 : vector<8x128xf32>
    %29 = vector.broadcast %4 : vector<1x128xf32> to vector<8x128xf32>
    %30 = arith.subf %29, %28 : vector<8x128xf32>
    %31 = arith.mulf %7, %26 : vector<8x128xf32>
    %32 = arith.addf %31, %30 : vector<8x128xf32>
    %cst_15 = arith.constant 0.000000e+00 : f32
    %33 = vector.broadcast %cst_15 : f32 to vector<8x128xf32>
    %34 = arith.maximumf %32, %33 : vector<8x128xf32>
    %c0_16 = arith.constant 0 : index
    %c0_17 = arith.constant 0 : index
    %35 = vector.load %arg6[%c0_16, %c0_17] : memref<128x128xf32, #tpu.memory_space<vmem>>, vector<128x128xf32>
    %c0_18 = arith.constant 0 : index
    %c0_19 = arith.constant 0 : index
    %36 = vector.load %arg7[%c0_18, %c0_19] : memref<1x128xf32, #tpu.memory_space<vmem>>, vector<1x128xf32>
    %c0_20 = arith.constant 0 : index
    %c0_21 = arith.constant 0 : index
    %37 = vector.load %arg8[%c0_20, %c0_21] : memref<1x128xf32, #tpu.memory_space<vmem>>, vector<1x128xf32>
    %c0_22 = arith.constant 0 : index
    %c0_23 = arith.constant 0 : index
    %38 = vector.load %arg9[%c0_22, %c0_23] : memref<1x128xf32, #tpu.memory_space<vmem>>, vector<1x128xf32>
    %cst_24 = arith.constant dense<0.000000e+00> : vector<8x128xf32>
    %39 = tpu.matmul %34, %35, %cst_24 {dimension_numbers = #tpu.dot_dimension_numbers<[1], [0], [0], [1], [0, 0, 1, 1], [], []>} : vector<8x128xf32>, vector<128x128xf32>, vector<8x128xf32> -> vector<8x128xf32>
    %40 = vector.broadcast %36 : vector<1x128xf32> to vector<8x128xf32>
    %41 = arith.addf %39, %40 : vector<8x128xf32>
    %cst_25 = arith.constant dense<0.000000e+00> : vector<8xf32>
    %42 = vector.multi_reduction <add>, %41, %cst_25 [1] : vector<8x128xf32> to vector<8xf32>
    %43 = vector.shape_cast %42 : vector<8xf32> to vector<8x1xf32>
    %44 = arith.mulf %41, %41 : vector<8x128xf32>
    %cst_26 = arith.constant dense<0.000000e+00> : vector<8xf32>
    %45 = vector.multi_reduction <add>, %44, %cst_26 [1] : vector<8x128xf32> to vector<8xf32>
    %46 = vector.shape_cast %45 : vector<8xf32> to vector<8x1xf32>
    %cst_27 = arith.constant 3.125000e-02 : f32
    %47 = vector.broadcast %cst_27 : f32 to vector<8x1xf32>
    %48 = arith.mulf %43, %47 : vector<8x1xf32>
    %cst_28 = arith.constant 3.125000e-02 : f32
    %49 = vector.broadcast %cst_28 : f32 to vector<8x1xf32>
    %50 = arith.mulf %46, %49 : vector<8x1xf32>
    %51 = arith.mulf %48, %48 : vector<8x1xf32>
    %52 = arith.subf %50, %51 : vector<8x1xf32>
    %cst_29 = arith.constant 0.000000e+00 : f32
    %53 = vector.broadcast %cst_29 : f32 to vector<8x1xf32>
    %54 = arith.maximumf %52, %53 : vector<8x1xf32>
    %cst_30 = arith.constant 9.99999974E-6 : f32
    %55 = vector.broadcast %cst_30 : f32 to vector<8x1xf32>
    %56 = arith.addf %54, %55 : vector<8x1xf32>
    %57 = math.rsqrt %56 : vector<8x1xf32>
    %58 = vector.broadcast %37 : vector<1x128xf32> to vector<8x128xf32>
    %59 = vector.broadcast %57 : vector<8x1xf32> to vector<8x128xf32>
    %60 = arith.mulf %58, %59 : vector<8x128xf32>
    %61 = vector.broadcast %48 : vector<8x1xf32> to vector<8x128xf32>
    %62 = arith.mulf %61, %60 : vector<8x128xf32>
    %63 = vector.broadcast %38 : vector<1x128xf32> to vector<8x128xf32>
    %64 = arith.subf %63, %62 : vector<8x128xf32>
    %65 = arith.mulf %41, %60 : vector<8x128xf32>
    %66 = arith.addf %65, %64 : vector<8x128xf32>
    %cst_31 = arith.constant 0.000000e+00 : f32
    %67 = vector.broadcast %cst_31 : f32 to vector<8x128xf32>
    %68 = arith.maximumf %66, %67 : vector<8x128xf32>
    %c0_32 = arith.constant 0 : index
    %c0_33 = arith.constant 0 : index
    %69 = vector.load %arg10[%c0_32, %c0_33] : memref<128x128xf32, #tpu.memory_space<vmem>>, vector<128x128xf32>
    %c0_34 = arith.constant 0 : index
    %c0_35 = arith.constant 0 : index
    %70 = vector.load %arg11[%c0_34, %c0_35] : memref<1x128xf32, #tpu.memory_space<vmem>>, vector<1x128xf32>
    %c0_36 = arith.constant 0 : index
    %c0_37 = arith.constant 0 : index
    %71 = vector.load %arg12[%c0_36, %c0_37] : memref<1x128xf32, #tpu.memory_space<vmem>>, vector<1x128xf32>
    %c0_38 = arith.constant 0 : index
    %c0_39 = arith.constant 0 : index
    %72 = vector.load %arg13[%c0_38, %c0_39] : memref<1x128xf32, #tpu.memory_space<vmem>>, vector<1x128xf32>
    %cst_40 = arith.constant dense<0.000000e+00> : vector<8x128xf32>
    %73 = tpu.matmul %68, %69, %cst_40 {dimension_numbers = #tpu.dot_dimension_numbers<[1], [0], [0], [1], [0, 0, 1, 1], [], []>} : vector<8x128xf32>, vector<128x128xf32>, vector<8x128xf32> -> vector<8x128xf32>
    %74 = vector.broadcast %70 : vector<1x128xf32> to vector<8x128xf32>
    %75 = arith.addf %73, %74 : vector<8x128xf32>
    %cst_41 = arith.constant dense<0.000000e+00> : vector<8xf32>
    %76 = vector.multi_reduction <add>, %75, %cst_41 [1] : vector<8x128xf32> to vector<8xf32>
    %77 = vector.shape_cast %76 : vector<8xf32> to vector<8x1xf32>
    %78 = arith.mulf %75, %75 : vector<8x128xf32>
    %cst_42 = arith.constant dense<0.000000e+00> : vector<8xf32>
    %79 = vector.multi_reduction <add>, %78, %cst_42 [1] : vector<8x128xf32> to vector<8xf32>
    %80 = vector.shape_cast %79 : vector<8xf32> to vector<8x1xf32>
    %cst_43 = arith.constant 3.125000e-02 : f32
    %81 = vector.broadcast %cst_43 : f32 to vector<8x1xf32>
    %82 = arith.mulf %77, %81 : vector<8x1xf32>
    %cst_44 = arith.constant 3.125000e-02 : f32
    %83 = vector.broadcast %cst_44 : f32 to vector<8x1xf32>
    %84 = arith.mulf %80, %83 : vector<8x1xf32>
    %85 = arith.mulf %82, %82 : vector<8x1xf32>
    %86 = arith.subf %84, %85 : vector<8x1xf32>
    %cst_45 = arith.constant 0.000000e+00 : f32
    %87 = vector.broadcast %cst_45 : f32 to vector<8x1xf32>
    %88 = arith.maximumf %86, %87 : vector<8x1xf32>
    %cst_46 = arith.constant 9.99999974E-6 : f32
    %89 = vector.broadcast %cst_46 : f32 to vector<8x1xf32>
    %90 = arith.addf %88, %89 : vector<8x1xf32>
    %91 = math.rsqrt %90 : vector<8x1xf32>
    %92 = vector.broadcast %71 : vector<1x128xf32> to vector<8x128xf32>
    %93 = vector.broadcast %91 : vector<8x1xf32> to vector<8x128xf32>
    %94 = arith.mulf %92, %93 : vector<8x128xf32>
    %95 = vector.broadcast %82 : vector<8x1xf32> to vector<8x128xf32>
    %96 = arith.mulf %95, %94 : vector<8x128xf32>
    %97 = vector.broadcast %72 : vector<1x128xf32> to vector<8x128xf32>
    %98 = arith.subf %97, %96 : vector<8x128xf32>
    %99 = arith.mulf %75, %94 : vector<8x128xf32>
    %100 = arith.addf %99, %98 : vector<8x128xf32>
    %cst_47 = arith.constant 0.000000e+00 : f32
    %101 = vector.broadcast %cst_47 : f32 to vector<8x128xf32>
    %102 = arith.maximumf %100, %101 : vector<8x128xf32>
    %c0_48 = arith.constant 0 : index
    %c0_49 = arith.constant 0 : index
    %103 = vector.load %arg14[%c0_48, %c0_49] : memref<128x1xf32, #tpu.memory_space<vmem>>, vector<128x1xf32>
    %c0_50 = arith.constant 0 : index
    %c0_51 = arith.constant 0 : index
    %104 = vector.load %arg15[%c0_50, %c0_51] : memref<1x1xf32, #tpu.memory_space<vmem>>, vector<1x1xf32>
    %cst_52 = arith.constant dense<0.000000e+00> : vector<8x1xf32>
    %105 = tpu.matmul %102, %103, %cst_52 {dimension_numbers = #tpu.dot_dimension_numbers<[1], [0], [0], [1], [0, 0, 1, 1], [], []>} : vector<8x128xf32>, vector<128x1xf32>, vector<8x1xf32> -> vector<8x1xf32>
    %106 = vector.broadcast %104 : vector<1x1xf32> to vector<8x1xf32>
    %107 = arith.addf %105, %106 : vector<8x1xf32>
    %c0_53 = arith.constant 0 : index
    %c0_54 = arith.constant 0 : index
    %108 = vector.load %arg16[%c0_53, %c0_54] : memref<8x1xf32, #tpu.memory_space<vmem>>, vector<8x1xf32>
    tpu.vector_store %arg16[%c0_53, %c0_54], %107 {strides = array<i32>} : memref<8x1xf32, #tpu.memory_space<vmem>>, vector<8x1xf32>,
    return
  }
  func.func @transform_0(%arg0: i32) -> (i32, i32) {
    %c0_i32 = arith.constant 0 : i32
    %c0_i32_0 = arith.constant 0 : i32
    return %arg0, %c0_i32 : i32, i32
  }
  func.func @transform_1(%arg0: i32) -> (i32, i32) {
    %c0_i32 = arith.constant 0 : i32
    %c0_i32_0 = arith.constant 0 : i32
    %c0_i32_1 = arith.constant 0 : i32
    return %c0_i32, %c0_i32_0 : i32, i32
  }
  func.func @transform_2(%arg0: i32) -> (i32, i32) {
    %c0_i32 = arith.constant 0 : i32
    %c0_i32_0 = arith.constant 0 : i32
    %c0_i32_1 = arith.constant 0 : i32
    return %c0_i32, %c0_i32_0 : i32, i32
  }
  func.func @transform_3(%arg0: i32) -> (i32, i32) {
    %c0_i32 = arith.constant 0 : i32
    %c0_i32_0 = arith.constant 0 : i32
    %c0_i32_1 = arith.constant 0 : i32
    return %c0_i32, %c0_i32_0 : i32, i32
  }
  func.func @transform_4(%arg0: i32) -> (i32, i32) {
    %c0_i32 = arith.constant 0 : i32
    %c0_i32_0 = arith.constant 0 : i32
    %c0_i32_1 = arith.constant 0 : i32
    return %c0_i32, %c0_i32_0 : i32, i32
  }
  func.func @transform_5(%arg0: i32) -> (i32, i32) {
    %c0_i32 = arith.constant 0 : i32
    %c0_i32_0 = arith.constant 0 : i32
    %c0_i32_1 = arith.constant 0 : i32
    return %c0_i32, %c0_i32_0 : i32, i32
  }
  func.func @transform_6(%arg0: i32) -> (i32, i32) {
    %c0_i32 = arith.constant 0 : i32
    %c0_i32_0 = arith.constant 0 : i32
    %c0_i32_1 = arith.constant 0 : i32
    return %c0_i32, %c0_i32_0 : i32, i32
  }
  func.func @transform_7(%arg0: i32) -> (i32, i32) {
    %c0_i32 = arith.constant 0 : i32
    %c0_i32_0 = arith.constant 0 : i32
    %c0_i32_1 = arith.constant 0 : i32
    return %c0_i32, %c0_i32_0 : i32, i32
  }
  func.func @transform_8(%arg0: i32) -> (i32, i32) {
    %c0_i32 = arith.constant 0 : i32
    %c0_i32_0 = arith.constant 0 : i32
    %c0_i32_1 = arith.constant 0 : i32
    return %c0_i32, %c0_i32_0 : i32, i32
  }
  func.func @transform_9(%arg0: i32) -> (i32, i32) {
    %c0_i32 = arith.constant 0 : i32
    %c0_i32_0 = arith.constant 0 : i32
    %c0_i32_1 = arith.constant 0 : i32
    return %c0_i32, %c0_i32_0 : i32, i32
  }
  func.func @transform_10(%arg0: i32) -> (i32, i32) {
    %c0_i32 = arith.constant 0 : i32
    %c0_i32_0 = arith.constant 0 : i32
    %c0_i32_1 = arith.constant 0 : i32
    return %c0_i32, %c0_i32_0 : i32, i32
  }
  func.func @transform_11(%arg0: i32) -> (i32, i32) {
    %c0_i32 = arith.constant 0 : i32
    %c0_i32_0 = arith.constant 0 : i32
    %c0_i32_1 = arith.constant 0 : i32
    return %c0_i32, %c0_i32_0 : i32, i32
  }
  func.func @transform_12(%arg0: i32) -> (i32, i32) {
    %c0_i32 = arith.constant 0 : i32
    %c0_i32_0 = arith.constant 0 : i32
    %c0_i32_1 = arith.constant 0 : i32
    return %c0_i32, %c0_i32_0 : i32, i32
  }
  func.func @transform_13(%arg0: i32) -> (i32, i32) {
    %c0_i32 = arith.constant 0 : i32
    %c0_i32_0 = arith.constant 0 : i32
    %c0_i32_1 = arith.constant 0 : i32
    return %c0_i32, %c0_i32_0 : i32, i32
  }
  func.func @transform_14(%arg0: i32) -> (i32, i32) {
    %c0_i32 = arith.constant 0 : i32
    %c0_i32_0 = arith.constant 0 : i32
    %c0_i32_1 = arith.constant 0 : i32
    return %c0_i32, %c0_i32_0 : i32, i32
  }
  func.func @transform_15(%arg0: i32) -> (i32, i32) {
    %c0_i32 = arith.constant 0 : i32
    %c0_i32_0 = arith.constant 0 : i32
    return %arg0, %c0_i32 : i32, i32
  }
}

</mosaic_0001>

<bundles_post_ra>
// kernel: tpu_custom_call.1
= control target key start
LH: loop header
LB: loop body
LE: loop exit
PB: predicated region body
PF: predicated region fallthrough
CT: control target
= control target key end

     0   :  { %s1085_s0 = inlined_call_operand.vmem [shape: f32[8,8], index: 0, kind: input, shape index: {}]   ;;  %s1086_s1 = inlined_call_operand.vmem [shape: f32[8,128], index: 1, kind: input, shape index: {}]   ;;  %s1087_s2 = inlined_call_operand.vmem [shape: f32[1,128], index: 2, kind: input, shape index: {}]   ;;  %s1088_s3 = inlined_call_operand.vmem [shape: f32[1,128], index: 3, kind: input, shape index: {}]   ;;  %s1089_s4 = inlined_call_operand.vmem [shape: f32[1,128], index: 4, kind: input, shape index: {}]   ;;  %s1090_s5 = inlined_call_operand.vmem [shape: f32[128,128], index: 5, kind: input, shape index: {}]   ;;  %s1091_s6 = inlined_call_operand.vmem [shape: f32[1,128], index: 6, kind: input, shape index: {}]   ;;  %s1092_s7 = inlined_call_operand.vmem [shape: f32[1,128], index: 7, kind: input, shape index: {}]   ;;  %s1093_s8 = inlined_call_operand.vmem [shape: f32[1,128], index: 8, kind: input, shape index: {}]   ;;  %s1094_s9 = inlined_call_operand.hbm [shape: f32[128,128], index: 9, kind: input, shape index: {}]   ;;  %s1095_s10 = inlined_call_operand.vmem [shape: f32[1,128], index: 10, kind: input, shape index: {}]   ;;  %s1096_s11 = inlined_call_operand.vmem [shape: f32[1,128], index: 11, kind: input, shape index: {}]   ;;  %s1097_s12 = inlined_call_operand.vmem [shape: f32[1,128], index: 12, kind: input, shape index: {}]   ;;  %s1098_s13 = inlined_call_operand.vmem [shape: f32[128,1], index: 13, kind: input, shape index: {}]   ;;  %s1099_s14 = inlined_call_operand.<no memory space> [shape: f32[1,1], index: 14, kind: input, shape index: {}]   ;;  %s1100_s15 = inlined_call_operand.vmem [shape: f32[8,1], index: 15, kind: output, shape index: {}]  }
   0x1   :  { %v20_v0 = vstv %s1099_s14 }
   0x2   :  { %21 = vst [vmem:[#allocation2] sm:$0x1] %v20_v0 }
   0x3   :  { %22 = vsyncpa [#allocation4], 0  ;;  %s813_s20 = smov [#allocation3]   ;;  %s789_s24 = scalar_lea.hbm %s1094_s9, 2048 }
   0x4   :  { %s46_s21 = sshll.u32 %s813_s20, 4  ;;  %p790_p0 = scmp.ne.s32.totalorder %s1094_s9, %s789_s24  ;;  %s47_s21 = int_to_ptr.vmem [resolvable:$true] %s46_s21 }
   0x5   :  { %p793_p1 = scmp.lt.u32.totalorder %s789_s24, %s1094_s9 }
   0x7   :  { %p795_p2 = pnand %p793_p1, %p790_p0 }
   0x9   :  { %798 = shalt.err (!%p795_p2)
}
   0xa   :  { %s799_s14 = scalar_lea.vmem %s47_s21, 2048  ;;  %p804_p4 = scmp.lt.s32.totalorder %s47_s21, %s47_s21 }
   0xb   :  { %p800_p3 = scmp.ne.s32.totalorder %s47_s21, %s799_s14  ;;  %p805_p5 = scmp.lt.s32.totalorder %s799_s14, %s799_s14 }
   0xd   :  { %p806_p6 = por %p805_p5, %p804_p4 }
   0xf   :  { %p807_p7 = pnand %p806_p6, %p800_p3 }
  0x11   :  { %810 = shalt.err (!%p807_p7)
}
  0x12   :  { %s814_s29 = smov 128   ;;  %s815_s30 = smov 8  }
  0x13   :  { %52 = dma.hbm_to_vmem [thread:$0]  %s1094_s9, 2048, %s47_s21, [#allocation4], %s814_s29, %s814_s29, %s815_s30  }
  0x14   :  { %811 = dma.done.wait [#allocation4], 2048  }
  0x15   :  { %812 = vsyncadd [#allocation4], 4294965248  ;;  %v816_v1 = vmov 0.0   ;;  %vm817_vm0 = vmmov 0   ;;  %vm77_vm1 = vcmask 64512   ;;  %v67_v2 = vld [vmem:[%s1086_s1] sm:$0xff] }
  0x16   :  { %595 = vmatprep.subr.mxu0 %v816_v1  ;;  %597 = vmatprep.mubr.msk.f32.mxu0 %vm817_vm0, %v816_v1  ;;  %v66_v3 = vld [vmem:[%s1085_s0] sm:$0xff]  ;;  %v182_v10 = vld [vmem:[%s1090_s5 + $0x8] sm:$0xff]  ;;  %v818_v12 = vmov 0.0|0.0   ;;  %v183_v13 = vld [vmem:[%s1090_s5 + $0x10] sm:$0xff]  ;;  %vm524_vm2 = vcmask 7168  }
  0x17   :  { %632 = vmatprep.mubr.msk.f32.mxu1 %vm817_vm0, %v816_v1  ;;  %596 = vmatpush3.msra.mxu0 %v67_v2  ;;  %v531_v4 = vld [vmem:[%s1087_s2] ss:$0 sm:$0xff]  ;;  %v184_v14 = vld [vmem:[%s1090_s5 + $0x18] sm:$0xff]  ;;  %v186_v17 = vld [vmem:[%s1090_s5 + $0x28] sm:$0xff] }
  0x18   :  { %598 = vmatmul.mubr.msk.f32.vlgmr.msra.gmra.mrb[0].mxu0 %vm77_vm1, %v66_v3  ;;  %v181_v9 = vld [vmem:[%s1090_s5] sm:$0xff]  ;;  %705 = vmatprep.subr.bf16.mxu1 %v818_v12  ;;  %v709_v15 = vpack.c.bf16 %v184_v14, %v183_v13  ;;  %v187_v19 = vld [vmem:[%s1090_s5 + $0x30] sm:$0xff]  ;;  %v188_v20 = vld [vmem:[%s1090_s5 + $0x38] sm:$0xff] }
  0x19   :  { %667 = vmatprep.mubr.msk.f32.mxu0 %vm817_vm0, %v816_v1  ;;  %v706_v11 = vpack.c.bf16 %v182_v10, %v181_v9  ;;  %729 = vmatprep.subr.bf16.mxu0 %v818_v12  ;;  %v185_v16 = vld [vmem:[%s1090_s5 + $0x20] sm:$0xff]  ;;  %v715_v21 = vpack.c.bf16 %v188_v20, %v187_v19  ;;  %v190_v23 = vld [vmem:[%s1090_s5 + $0x48] sm:$0xff]  ;;  %v191_v25 = vld [vmem:[%s1090_s5 + $0x50] sm:$0xff] }
  0x1a   :  { %v712_v18 = vpack.c.bf16 %v186_v17, %v185_v16  ;;  %v189_v22 = vld [vmem:[%s1090_s5 + $0x40] sm:$0xff]  ;;  %v192_v26 = vld [vmem:[%s1090_s5 + $0x58] sm:$0xff]  ;;  %v194_v29 = vld [vmem:[%s1090_s5 + $0x68] sm:$0xff] }
  0x1b   :  { %707 = vmatpush3.bf16.msra.mxu1 %v706_v11  ;;  %v718_v24 = vpack.c.bf16 %v190_v23, %v189_v22  ;;  %v721_v27 = vpack.c.bf16 %v192_v26, %v191_v25  ;;  %v193_v28 = vld [vmem:[%s1090_s5 + $0x60] sm:$0xff]  ;;  %v195_v31 = vld [vmem:[%s1090_s5 + $0x70] sm:$0xff]  ;;  %v196_v32 = vld [vmem:[%s1090_s5 + $0x78] sm:$0xff] }
  0x1c   :  { %708 = vmatprep.subr.bf16.mxu1 %v818_v12  ;;  %v724_v30 = vpack.c.bf16 %v194_v29, %v193_v28  ;;  %v727_v33 = vpack.c.bf16 %v196_v32, %v195_v31  ;;  %v533_v42 = vld [vmem:[%s1088_s3] ss:$0 sm:$0xff]  ;;  %v306_v56 = vld [vmem:[#allocation3] sm:$0xff]  ;;  %v307_v57 = vld [vmem:[#allocation3 + $0x8] sm:$0xff] }
  0x1d   :  { %v534_v45 = vld [vmem:[%s1089_s4] ss:$0 sm:$0xff]  ;;  %v730_v58 = vpack.c.bf16 %v307_v57, %v306_v56  ;;  %v308_v59 = vld [vmem:[#allocation3 + $0x10] sm:$0xff]  ;;  %v310_v62 = vld [vmem:[#allocation3 + $0x20] sm:$0xff] }
  0x1e   :  { %v535_v51 = vld [vmem:[%s1091_s6] ss:$0 sm:$0xff]  ;;  %v311_v63 = vld [vmem:[#allocation3 + $0x28] sm:$0xff]  ;;  %v318_v10 = vld [vmem:[#allocation3 + $0x60] sm:$0xff] }
  0x1f   :  { %710 = vmatpush3.bf16.msra.mxu1 %v709_v15  ;;  %731 = vmatpush3.bf16.msra.mxu0 %v730_v58  ;;  %v309_v60 = vld [vmem:[#allocation3 + $0x18] sm:$0xff]  ;;  %v736_v0 = vpack.c.bf16 %v311_v63, %v310_v62  ;;  %v319_v11 = vld [vmem:[#allocation3 + $0x68] sm:$0xff]  ;;  %v320_v14 = vld [vmem:[#allocation3 + $0x70] sm:$0xff] }
  0x20   :  { %711 = vmatprep.subr.bf16.mxu1 %v818_v12  ;;  %732 = vmatprep.subr.bf16.mxu0 %v818_v12  ;;  %v733_v61 = vpack.c.bf16 %v309_v60, %v308_v59  ;;  %v313_v2 = vld [vmem:[#allocation3 + $0x38] sm:$0xff]  ;;  %v748_v13 = vpack.c.bf16 %v319_v11, %v318_v10  ;;  %v444_v58 = vld [vmem:[%s1098_s13 + $0x68] sm:$0xff]  ;;  %v445_v60 = vld [vmem:[%s1098_s13 + $0x70] sm:$0xff] }
  0x21   :  { %v321_v15 = vld [vmem:[#allocation3 + $0x78] sm:$0xff] }
  0x22   :  { %v751_v16 = vpack.c.bf16 %v321_v15, %v320_v14  ;;  %v536_v25 = vld [vmem:[%s1092_s7] ss:$0 sm:$0xff] }
  0x23   :  { %713 = vmatpush3.bf16.msra.mxu1 %v712_v18  ;;  %734 = vmatpush3.bf16.msra.mxu0 %v733_v61  ;;  %v537_v28 = vld [vmem:[%s1093_s8] ss:$0 sm:$0xff]  ;;  %v446_v61 = vld [vmem:[%s1098_s13 + $0x78] sm:$0xff] }
  0x24   :  { %714 = vmatprep.subr.bf16.mxu1 %v818_v12  ;;  %735 = vmatprep.subr.bf16.mxu0 %v818_v12  ;;  %v443_v57 = vld [vmem:[%s1098_s13 + $0x60] sm:$0xff]  ;;  %v775_v62 = vpack.c.bf16 %v446_v61, %v445_v60 }
  0x25   :  { %v772_v59 = vpack.c.bf16 %v444_v58, %v443_v57 }
  0x27   :  { %716 = vmatpush3.bf16.msra.mxu1 %v715_v21  ;;  %737 = vmatpush3.bf16.msra.mxu0 %v736_v0 }
  0x28   :  { %717 = vmatprep.subr.bf16.mxu1 %v818_v12  ;;  %738 = vmatprep.subr.bf16.mxu0 %v818_v12 }
  0x2b   :  { %719 = vmatpush3.bf16.msra.mxu1 %v718_v24 }
  0x2c   :  { %720 = vmatprep.subr.bf16.mxu1 %v818_v12 }
  0x2f   :  { %722 = vmatpush3.bf16.msra.mxu1 %v721_v27 }
  0x30   :  { %723 = vmatprep.subr.bf16.mxu1 %v818_v12 }
  0x33   :  { %725 = vmatpush3.bf16.msra.mxu1 %v724_v30 }
  0x34   :  { %726 = vmatprep.subr.bf16.mxu1 %v818_v12 }
  0x37   :  { %728 = vmatpush3.bf16.msra.mxu1 %v727_v33 }
  0x38   :  { %753 = vmatprep.subr.bf16.mxu1 %v818_v12 }
  0xeb   :  { %v147_v5 = vpop.f32.mrb[0].mxu0 }
  0xec   :  { %v930_v6 = vadd.f32 %v531_v4, %v147_v5  ;;  %v599_v7 = vpop.f32.mrb[1].mxu0  ;;  %v314_v4 = vld [vmem:[#allocation3 + $0x40] sm:$0xff]  ;;  %v315_v5 = vld [vmem:[#allocation3 + $0x48] sm:$0xff] }
  0xed   :  { %v316_v7 = vld [vmem:[#allocation3 + $0x50] sm:$0xff] }
  0xee   :  { %151 = vadd.xlane.f32.xlu0 %v930_v6  ;;  %v153_v8 = vmul.f32 %v930_v6, %v930_v6 }
  0xf2   :  { %154 = vadd.xlane.f32.xlu0 %v153_v8  ;;  %v317_v8 = vld [vmem:[#allocation3 + $0x58] sm:$0xff] }
  0xf3   :  { %v745_v9 = vpack.c.bf16 %v317_v8, %v316_v7  ;;  %v539_v7 = vld [vmem:[%s1096_s11] ss:$0 sm:$0xff] }
 0x17b   :  { %v152_v34 = vpop.xlane.xlu0 %151 }
 0x17c   :  { %v156_v35 = vmul.f32 0.03125, %v152_v34  ;;  %v538_v34 = vld [vmem:[%s1095_s10] ss:$0 sm:$0xff] }
 0x17e   :  { %v158_v37 = vmul.f32 %v156_v35, %v156_v35 }
 0x17f   :  { %v155_v36 = vpop.xlane.xlu0 %154 }
 0x180   :  { %v157_v38 = vmul.f32 0.03125, %v155_v36 }
 0x182   :  { %v159_v39 = vsub.f32 %v157_v38, %v158_v37 }
 0x184   :  { %v160_v40 = vmax.f32 %v159_v39, 0.0  ;;  %v431_v39 = vld [vmem:[%s1098_s13] sm:$0xff] }
 0x186   :  { %v161_v41 = vadd.f32 1e-05, %v160_v40  ;;  %v432_v40 = vld [vmem:[%s1098_s13 + $0x8] sm:$0xff] }
 0x188   :  { %783 = vrsqrt.f32 %v161_v41  ;;  %v754_v41 = vpack.c.bf16 %v432_v40, %v431_v39 }
 0x192   :  { %v784_v43 = vpop.eup %783 }
 0x193   :  { %v169_v44 = vmul.f32 %v784_v43, %v533_v42  ;;  %v433_v42 = vld [vmem:[%s1098_s13 + $0x10] sm:$0xff]  ;;  %v434_v43 = vld [vmem:[%s1098_s13 + $0x18] sm:$0xff] }
 0x195   :  { %v170_v46 = vmul.f32 %v169_v44, %v156_v35  ;;  %v178_v48 = vmul.f32 %v169_v44, %v930_v6  ;;  %v742_v6 = vpack.c.bf16 %v315_v5, %v314_v4  ;;  %v757_v44 = vpack.c.bf16 %v434_v43, %v433_v42 }
 0x197   :  { %v177_v47 = vsub.f32 %v534_v45, %v170_v46  ;;  %v435_v45 = vld [vmem:[%s1098_s13 + $0x20] sm:$0xff]  ;;  %v436_v46 = vld [vmem:[%s1098_s13 + $0x28] sm:$0xff] }
 0x199   :  { %v179_v49 = vadd.f32 %v178_v48, %v177_v47  ;;  %v760_v47 = vpack.c.bf16 %v436_v46, %v435_v45  ;;  %v437_v48 = vld [vmem:[%s1098_s13 + $0x30] sm:$0xff] }
 0x19b   :  { %v180_v50 = vmax.f32 %v179_v49, 0.0  ;;  %v438_v49 = vld [vmem:[%s1098_s13 + $0x38] sm:$0xff] }
 0x19d   :  { %633 = vmatmul.mubr.f32.vlgmr.msra.gmra.mrb[0].mxu1 %v180_v50  ;;  %v763_v50 = vpack.c.bf16 %v438_v49, %v437_v48 }
 0x19e   :  { %702 = vmatprep.mubr.msk.f32.mxu1 %vm817_vm0, %v816_v1  ;;  %v312_v1 = vld [vmem:[#allocation3 + $0x30] sm:$0xff]  ;;  %755 = vmatpush3.bf16.msra.mxu1 %v754_v41 }
 0x19f   :  { %v739_v3 = vpack.c.bf16 %v313_v2, %v312_v1  ;;  %756 = vmatprep.subr.bf16.mxu1 %v818_v12 }
 0x1a1   :  { %740 = vmatpush3.bf16.msra.mxu0 %v739_v3 }
 0x1a2   :  { %741 = vmatprep.subr.bf16.mxu0 %v818_v12  ;;  %758 = vmatpush3.bf16.msra.mxu1 %v757_v44 }
 0x1a3   :  { %759 = vmatprep.subr.bf16.mxu1 %v818_v12 }
 0x1a5   :  { %743 = vmatpush3.bf16.msra.mxu0 %v742_v6 }
 0x1a6   :  { %744 = vmatprep.subr.bf16.mxu0 %v818_v12  ;;  %761 = vmatpush3.bf16.msra.mxu1 %v760_v47 }
 0x1a7   :  { %762 = vmatprep.subr.bf16.mxu1 %v818_v12 }
 0x1a9   :  { %746 = vmatpush3.bf16.msra.mxu0 %v745_v9 }
 0x1aa   :  { %747 = vmatprep.subr.bf16.mxu0 %v818_v12  ;;  %764 = vmatpush3.bf16.msra.mxu1 %v763_v50 }
 0x1ab   :  { %765 = vmatprep.subr.bf16.mxu1 %v818_v12 }
 0x1ad   :  { %749 = vmatpush3.bf16.msra.mxu0 %v748_v13 }
 0x1ae   :  { %750 = vmatprep.subr.bf16.mxu0 %v818_v12 }
 0x1b1   :  { %752 = vmatpush3.bf16.msra.mxu0 %v751_v16  ;;  %v541_v16 = vld [vmem:[#allocation2] ss:$0 sm:$0xff] }
 0x270   :  { %v272_v52 = vpop.f32.mrb[0].mxu1 }
 0x271   :  { %v273_v53 = vadd.f32 %v535_v51, %v272_v52  ;;  %v634_v54 = vpop.f32.mrb[1].mxu1  ;;  %v439_v51 = vld [vmem:[%s1098_s13 + $0x40] sm:$0xff]  ;;  %v440_v52 = vld [vmem:[%s1098_s13 + $0x48] sm:$0xff] }
 0x272   :  { %v441_v54 = vld [vmem:[%s1098_s13 + $0x50] sm:$0xff] }
 0x273   :  { %276 = vadd.xlane.f32.xlu1 %v273_v53  ;;  %v278_v55 = vmul.f32 %v273_v53, %v273_v53 }
 0x277   :  { %279 = vadd.xlane.f32.xlu1 %v278_v55  ;;  %v442_v55 = vld [vmem:[%s1098_s13 + $0x58] sm:$0xff] }
 0x278   :  { %v769_v56 = vpack.c.bf16 %v442_v55, %v441_v54 }
 0x300   :  { %v277_v17 = vpop.xlane.xlu1 %276 }
 0x301   :  { %v281_v18 = vmul.f32 0.03125, %v277_v17 }
 0x303   :  { %v283_v20 = vmul.f32 %v281_v18, %v281_v18 }
 0x304   :  { %v280_v19 = vpop.xlane.xlu1 %279 }
 0x305   :  { %v282_v21 = vmul.f32 0.03125, %v280_v19 }
 0x307   :  { %v284_v22 = vsub.f32 %v282_v21, %v283_v20 }
 0x309   :  { %v285_v23 = vmax.f32 %v284_v22, 0.0 }
 0x30b   :  { %v286_v24 = vadd.f32 1e-05, %v285_v23 }
 0x30d   :  { %785 = vrsqrt.f32 %v286_v24 }
 0x317   :  { %v786_v26 = vpop.eup %785 }
 0x318   :  { %v294_v27 = vmul.f32 %v786_v26, %v536_v25 }
 0x31a   :  { %v295_v29 = vmul.f32 %v294_v27, %v281_v18  ;;  %v303_v31 = vmul.f32 %v294_v27, %v273_v53  ;;  %v766_v53 = vpack.c.bf16 %v440_v52, %v439_v51 }
 0x31c   :  { %v302_v30 = vsub.f32 %v537_v28, %v295_v29  ;;  %767 = vmatpush3.bf16.msra.mxu1 %v766_v53 }
 0x31d   :  { %768 = vmatprep.subr.bf16.mxu1 %v818_v12 }
 0x31e   :  { %v304_v32 = vadd.f32 %v303_v31, %v302_v30 }
 0x320   :  { %v305_v33 = vmax.f32 %v304_v32, 0.0  ;;  %770 = vmatpush3.bf16.msra.mxu1 %v769_v56 }
 0x321   :  { %771 = vmatprep.subr.bf16.mxu1 %v818_v12 }
 0x322   :  { %668 = vmatmul.mubr.f32.vlgmr.msra.gmra.mrb[2].mxu0 %v305_v33 }
 0x324   :  { %773 = vmatpush3.bf16.msra.mxu1 %v772_v59 }
 0x325   :  { %774 = vmatprep.subr.bf16.mxu1 %v818_v12  ;;  %v540_v12 = vld [vmem:[%s1097_s12] ss:$0 sm:$0xff] }
 0x328   :  { %776 = vmatpush3.bf16.msra.mxu1 %v775_v62 }
 0x3f5   :  { %v397_v35 = vpop.f32.mrb[2].mxu0 }
 0x3f6   :  { %v398_v36 = vadd.f32 %v538_v34, %v397_v35  ;;  %v669_v37 = vpop.f32.mrb[3].mxu0 }
 0x3f8   :  { %401 = vadd.xlane.f32.xlu0 %v398_v36  ;;  %v403_v38 = vmul.f32 %v398_v36, %v398_v36 }
 0x3fa   :  { %404 = vadd.xlane.f32.xlu1 %v403_v38 }
 0x485   :  { %v402_v63 = vpop.xlane.xlu0 %401 }
 0x486   :  { %v406_v0 = vmul.f32 0.03125, %v402_v63 }
 0x487   :  { %v405_v1 = vpop.xlane.xlu1 %404 }
 0x488   :  { %v408_v2 = vmul.f32 %v406_v0, %v406_v0  ;;  %v407_v3 = vmul.f32 0.03125, %v405_v1 }
 0x48a   :  { %v409_v4 = vsub.f32 %v407_v3, %v408_v2 }
 0x48c   :  { %v410_v5 = vmax.f32 %v409_v4, 0.0 }
 0x48e   :  { %v411_v6 = vadd.f32 1e-05, %v410_v5 }
 0x490   :  { %787 = vrsqrt.f32 %v411_v6 }
 0x49a   :  { %v788_v8 = vpop.eup %787 }
 0x49b   :  { %v419_v9 = vmul.f32 %v788_v8, %v539_v7 }
 0x49d   :  { %v420_v10 = vmul.f32 %v419_v9, %v406_v0  ;;  %v428_v13 = vmul.f32 %v419_v9, %v398_v36 }
 0x49f   :  { %v427_v11 = vsub.f32 %v540_v12, %v420_v10 }
 0x4a1   :  { %v429_v14 = vadd.f32 %v428_v13, %v427_v11 }
 0x4a3   :  { %v430_v15 = vmax.f32 %v429_v14, 0.0 }
 0x4a5   :  { %703 = vmatmul.mubr.f32.vlgmr.msra.gmra.mrb[2].mxu1 %v430_v15 }
 0x578   :  { %v520_v17 = vpop.f32.mrb[2].mxu1 }
 0x579   :  { %v521_v18 = vadd.f32 %v541_v16, %v520_v17  ;;  %v704_v19 = vpop.f32.mrb[3].mxu1 }
 0x57b   :  { %525 = vst.msk [vmem:[%s1100_s15] sm:$0xff] %vm524_vm2, %v521_v18 }
 0x57c   :  { %530 = vsyncpa [#allocation4], 1 }

</bundles_post_ra>
